<compile_context>
chip_gen: v5e
topology: v5e:2x2
jax: 0.10.0
libtpu: 0.0.40
codegen_flags: <defaults>
</compile_context>

<pallas_src>
import jax
import jax.numpy as jnp
from jax import lax
from jax.experimental import pallas as pl
from jax.experimental.pallas import tpu as pltpu


def _make_kernel(c, h, w, pad, b_tile):
    hp = h + 2 * pad
    wp = w + 2 * pad
    eps = 1.0 / float(hp)  # == 1 / (h + 2*pad); h == w so same for both axes

    def kernel(shift_ref, x_ref, o_ref):
        # shift_ref : SMEM int32 (2, Npad)        -- row 0: x-shift, row 1: y-shift
        # x_ref     : VMEM (B_TILE, Hp, C*Wp)     -- replicate-padded slabs
        # o_ref     : VMEM (B_TILE, H,  C*W)      -- lane-dense output slabs
        g = pl.program_id(0)

        def body(b, carry):
            idx = g * b_tile + b
            sx = shift_ref[0, idx].astype(jnp.float32) * (2.0 * eps)
            sy = shift_ref[1, idx].astype(jnp.float32) * (2.0 * eps)

            # ---- Wy : (H, Hp) bilinear row weights -------------------------------
            ii = lax.broadcasted_iota(jnp.int32, (h, hp), 0).astype(jnp.float32)
            pp = lax.broadcasted_iota(jnp.int32, (h, hp), 1).astype(jnp.float32)
            gy = -1.0 + eps * (2.0 * ii + 1.0) + sy          # normalized grid y
            iy = ((gy + 1.0) * float(hp) - 1.0) * 0.5        # un-normalized position
            wy = jnp.maximum(0.0, 1.0 - jnp.abs(iy - pp))    # (H, Hp)

            # ---- block-diagonal Wx : (C*Wp, C*W) column weights ------------------
            # row index k = ck*Wp + q (padded col), column index m = cm*W + j (out col)
            ki = lax.broadcasted_iota(jnp.int32, (c * wp, c * w), 0).astype(jnp.float32)
            mi = lax.broadcasted_iota(jnp.int32, (c * wp, c * w), 1).astype(jnp.float32)
            ck = jnp.floor((ki + 0.5) * (1.0 / float(wp)))   # row's channel
            qq = ki - ck * float(wp)                         # padded col within channel
            cm = jnp.floor((mi + 0.5) * (1.0 / float(w)))    # column's channel
            jj = mi - cm * float(w)                          # output col within channel
            gx = -1.0 + eps * (2.0 * jj + 1.0) + sx
            ix = ((gx + 1.0) * float(wp) - 1.0) * 0.5
            hat = jnp.maximum(0.0, 1.0 - jnp.abs(ix - qq))
            wxb = jnp.where(ck == cm, hat, 0.0)              # zero off-diagonal blocks

            # ---- two channel-batched MXU matmuls ---------------------------------
            slab = x_ref[b].astype(jnp.float32)                          # (Hp, C*Wp)
            t = jnp.dot(wy, slab, preferred_element_type=jnp.float32)    # (H,  C*Wp)
            out = jnp.dot(t, wxb, preferred_element_type=jnp.float32)    # (H,  C*W)
            o_ref[b] = out.astype(o_ref.dtype)
            return carry

        lax.fori_loop(0, b_tile, body, 0, unroll=True)

    return kernel


def random_shifts_aug(x, pad, key, *, b_tile=8):
    """JAX/Pallas equivalent of RandomShiftsAug(pad)(x), x in NCHW."""
    n, c, h, w = x.shape
    assert h == w
    hp, wp = h + 2 * pad, w + 2 * pad

    # Replicate padding (same as F.pad(..., 'replicate')) — JAX glue.
    xp = jnp.pad(x, ((0, 0), (0, 0), (pad, pad), (pad, pad)), mode="edge")
    # Lane-dense slab layout for the kernel: (N, Hp, C*Wp), slab[b,p,c*Wp+q]=xp[b,c,p,q]
    slab = jnp.transpose(xp, (0, 2, 1, 3)).reshape(n, hp, c * wp)

    # Per-image integer shift in [0, 2*pad] (matches torch.randint(0, 2*pad+1)).
    # Layout (2, N): tiny SMEM footprint after padding, unlike (N, 2).
    shift = jax.random.randint(key, (2, n), 0, 2 * pad + 1, dtype=jnp.int32)

    bt = min(b_tile, n)
    n_pad = ((n + bt - 1) // bt) * bt
    if n_pad != n:
        slab = jnp.pad(slab, ((0, n_pad - n), (0, 0), (0, 0)))
        shift = jnp.pad(shift, ((0, 0), (0, n_pad - n)))

    kernel = _make_kernel(c, h, w, pad, bt)
    grid_spec = pltpu.PrefetchScalarGridSpec(
        num_scalar_prefetch=1,
        grid=(n_pad // bt,),
        in_specs=[pl.BlockSpec((bt, hp, c * wp), lambda g, s: (g, 0, 0))],
        out_specs=pl.BlockSpec((bt, h, c * w), lambda g, s: (g, 0, 0)),
    )
    out = pl.pallas_call(
        kernel,
        out_shape=jax.ShapeDtypeStruct((n_pad, h, c * w), x.dtype),
        grid_spec=grid_spec,
        compiler_params=pltpu.CompilerParams(
            dimension_semantics=("parallel",),  # batch steps independent -> 2 TCs on v7x
        ),
    )(shift, slab)

    # Back to NCHW (wrapper-side layout plumbing).
    out = out[:n].reshape(n, h, c, w)
    return jnp.transpose(out, (0, 2, 1, 3))


if __name__ == "__main__":
    key = jax.random.PRNGKey(0)
    k_x, k_shift = jax.random.split(key)

    n, c, h, w = 2, 4, 16, 16
    pad = 4  # module hyperparameter (RandomShiftsAug(pad=4)); no learned weights

    x = jax.random.normal(k_x, (n, c, h, w), dtype=jnp.float32)
    y = random_shifts_aug(x, pad, k_shift)
    y = jax.block_until_ready(y)
    assert y.shape == (n, c, h, w) and y.dtype == x.dtype
    print("KERNEL_OK")
</pallas_src>

<mosaic_0001>
module attributes {stable_mosaic.version = 11 : i64} {
  func.func @kernel(%arg0: i32, %arg1: memref<2x2xi32, #tpu.memory_space<smem>>, %arg2: memref<2x24x96xf32, #tpu.memory_space<vmem>>, %arg3: memref<2x16x64xf32, #tpu.memory_space<vmem>>) attributes {dimension_semantics = [#tpu.dimension_semantics<parallel>], iteration_bounds = array<i64: 1>, scalar_prefetch = 1 : i64, scratch_operands = 0 : i64, tpu.core_type = #tpu.core_type<tc>, window_params = [{transform_indices = @transform_0, window_bounds = array<i64: 2, 24, 96>}, {transform_indices = @transform_1, window_bounds = array<i64: 2, 16, 64>}]} {
    %c0_i32 = arith.constant 0 : i32
    %c2_i32 = arith.constant 2 : i32
    %0 = arith.muli %arg0, %c2_i32 : i32
    %1 = arith.addi %0, %c0_i32 : i32
    %c0 = arith.constant 0 : index
    %2 = arith.index_cast %1 : i32 to index
    %3 = memref.load %arg1[%c0, %2] : memref<2x2xi32, #tpu.memory_space<smem>>
    %4 = arith.sitofp %3 : i32 to f32
    %cst = arith.constant 0.0833333358 : f32
    %5 = arith.mulf %4, %cst : f32
    %c1 = arith.constant 1 : index
    %6 = arith.index_cast %1 : i32 to index
    %7 = memref.load %arg1[%c1, %6] : memref<2x2xi32, #tpu.memory_space<smem>>
    %8 = arith.sitofp %7 : i32 to f32
    %cst_0 = arith.constant 0.0833333358 : f32
    %9 = arith.mulf %8, %cst_0 : f32
    %10 = tpu.iota {dimensions = array<i32: 0>} : vector<16x24xi32>
    %11 = arith.sitofp %10 : vector<16x24xi32> to vector<16x24xf32>
    %12 = tpu.iota {dimensions = array<i32: 1>} : vector<16x24xi32>
    %13 = arith.sitofp %12 : vector<16x24xi32> to vector<16x24xf32>
    %cst_1 = arith.constant 2.000000e+00 : f32
    %14 = vector.broadcast %cst_1 : f32 to vector<16x24xf32>
    %15 = arith.mulf %14, %11 : vector<16x24xf32>
    %cst_2 = arith.constant 1.000000e+00 : f32
    %16 = vector.broadcast %cst_2 : f32 to vector<16x24xf32>
    %17 = arith.addf %15, %16 : vector<16x24xf32>
    %cst_3 = arith.constant 0.0416666679 : f32
    %18 = vector.broadcast %cst_3 : f32 to vector<16x24xf32>
    %19 = arith.mulf %18, %17 : vector<16x24xf32>
    %cst_4 = arith.constant -1.000000e+00 : f32
    %20 = vector.broadcast %cst_4 : f32 to vector<16x24xf32>
    %21 = arith.addf %20, %19 : vector<16x24xf32>
    %22 = vector.broadcast %9 : f32 to vector<16x24xf32>
    %23 = arith.addf %21, %22 : vector<16x24xf32>
    %cst_5 = arith.constant 1.000000e+00 : f32
    %24 = vector.broadcast %cst_5 : f32 to vector<16x24xf32>
    %25 = arith.addf %23, %24 : vector<16x24xf32>
    %cst_6 = arith.constant 2.400000e+01 : f32
    %26 = vector.broadcast %cst_6 : f32 to vector<16x24xf32>
    %27 = arith.mulf %25, %26 : vector<16x24xf32>
    %cst_7 = arith.constant 1.000000e+00 : f32
    %28 = vector.broadcast %cst_7 : f32 to vector<16x24xf32>
    %29 = arith.subf %27, %28 : vector<16x24xf32>
    %cst_8 = arith.constant 5.000000e-01 : f32
    %30 = vector.broadcast %cst_8 : f32 to vector<16x24xf32>
    %31 = arith.mulf %29, %30 : vector<16x24xf32>
    %32 = arith.subf %31, %13 : vector<16x24xf32>
    %33 = math.absf %32 : vector<16x24xf32>
    %cst_9 = arith.constant 1.000000e+00 : f32
    %34 = vector.broadcast %cst_9 : f32 to vector<16x24xf32>
    %35 = arith.subf %34, %33 : vector<16x24xf32>
    %cst_10 = arith.constant 0.000000e+00 : f32
    %36 = vector.broadcast %cst_10 : f32 to vector<16x24xf32>
    %37 = arith.maximumf %36, %35 : vector<16x24xf32>
    %38 = tpu.iota {dimensions = array<i32: 0>} : vector<96x64xi32>
    %39 = arith.sitofp %38 : vector<96x64xi32> to vector<96x64xf32>
    %40 = tpu.iota {dimensions = array<i32: 1>} : vector<96x64xi32>
    %41 = arith.sitofp %40 : vector<96x64xi32> to vector<96x64xf32>
    %cst_11 = arith.constant 5.000000e-01 : f32
    %42 = vector.broadcast %cst_11 : f32 to vector<96x64xf32>
    %43 = arith.addf %39, %42 : vector<96x64xf32>
    %cst_12 = arith.constant 0.0416666679 : f32
    %44 = vector.broadcast %cst_12 : f32 to vector<96x64xf32>
    %45 = arith.mulf %43, %44 : vector<96x64xf32>
    %46 = math.floor %45 : vector<96x64xf32>
    %cst_13 = arith.constant 2.400000e+01 : f32
    %47 = vector.broadcast %cst_13 : f32 to vector<96x64xf32>
    %48 = arith.mulf %46, %47 : vector<96x64xf32>
    %49 = arith.subf %39, %48 : vector<96x64xf32>
    %cst_14 = arith.constant 5.000000e-01 : f32
    %50 = vector.broadcast %cst_14 : f32 to vector<96x64xf32>
    %51 = arith.addf %41, %50 : vector<96x64xf32>
    %cst_15 = arith.constant 6.250000e-02 : f32
    %52 = vector.broadcast %cst_15 : f32 to vector<96x64xf32>
    %53 = arith.mulf %51, %52 : vector<96x64xf32>
    %54 = math.floor %53 : vector<96x64xf32>
    %cst_16 = arith.constant 1.600000e+01 : f32
    %55 = vector.broadcast %cst_16 : f32 to vector<96x64xf32>
    %56 = arith.mulf %54, %55 : vector<96x64xf32>
    %57 = arith.subf %41, %56 : vector<96x64xf32>
    %cst_17 = arith.constant 2.000000e+00 : f32
    %58 = vector.broadcast %cst_17 : f32 to vector<96x64xf32>
    %59 = arith.mulf %58, %57 : vector<96x64xf32>
    %cst_18 = arith.constant 1.000000e+00 : f32
    %60 = vector.broadcast %cst_18 : f32 to vector<96x64xf32>
    %61 = arith.addf %59, %60 : vector<96x64xf32>
    %cst_19 = arith.constant 0.0416666679 : f32
    %62 = vector.broadcast %cst_19 : f32 to vector<96x64xf32>
    %63 = arith.mulf %62, %61 : vector<96x64xf32>
    %cst_20 = arith.constant -1.000000e+00 : f32
    %64 = vector.broadcast %cst_20 : f32 to vector<96x64xf32>
    %65 = arith.addf %64, %63 : vector<96x64xf32>
    %66 = vector.broadcast %5 : f32 to vector<96x64xf32>
    %67 = arith.addf %65, %66 : vector<96x64xf32>
    %cst_21 = arith.constant 1.000000e+00 : f32
    %68 = vector.broadcast %cst_21 : f32 to vector<96x64xf32>
    %69 = arith.addf %67, %68 : vector<96x64xf32>
    %cst_22 = arith.constant 2.400000e+01 : f32
    %70 = vector.broadcast %cst_22 : f32 to vector<96x64xf32>
    %71 = arith.mulf %69, %70 : vector<96x64xf32>
    %cst_23 = arith.constant 1.000000e+00 : f32
    %72 = vector.broadcast %cst_23 : f32 to vector<96x64xf32>
    %73 = arith.subf %71, %72 : vector<96x64xf32>
    %cst_24 = arith.constant 5.000000e-01 : f32
    %74 = vector.broadcast %cst_24 : f32 to vector<96x64xf32>
    %75 = arith.mulf %73, %74 : vector<96x64xf32>
    %76 = arith.subf %75, %49 : vector<96x64xf32>
    %77 = math.absf %76 : vector<96x64xf32>
    %cst_25 = arith.constant 1.000000e+00 : f32
    %78 = vector.broadcast %cst_25 : f32 to vector<96x64xf32>
    %79 = arith.subf %78, %77 : vector<96x64xf32>
    %cst_26 = arith.constant 0.000000e+00 : f32
    %80 = vector.broadcast %cst_26 : f32 to vector<96x64xf32>
    %81 = arith.maximumf %80, %79 : vector<96x64xf32>
    %82 = arith.cmpf oeq, %46, %54 : vector<96x64xf32>
    %cst_27 = arith.constant 0.000000e+00 : f32
    %83 = vector.broadcast %cst_27 : f32 to vector<96x64xf32>
    %84 = arith.select %82, %81, %83 : vector<96x64xi1>, vector<96x64xf32>
    %85 = arith.index_cast %c0_i32 : i32 to index
    %c0_28 = arith.constant 0 : index
    %c0_29 = arith.constant 0 : index
    %86 = vector.load %arg2[%85, %c0_28, %c0_29] : memref<2x24x96xf32, #tpu.memory_space<vmem>>, vector<1x24x96xf32>
    %87 = vector.shape_cast %86 : vector<1x24x96xf32> to vector<24x96xf32>
    %cst_30 = arith.constant dense<0.000000e+00> : vector<16x96xf32>
    %88 = tpu.matmul %37, %87, %cst_30 {dimension_numbers = #tpu.dot_dimension_numbers<[1], [0], [0], [1], [0, 0, 1, 1], [], []>} : vector<16x24xf32>, vector<24x96xf32>, vector<16x96xf32> -> vector<16x96xf32>
    %cst_31 = arith.constant dense<0.000000e+00> : vector<16x64xf32>
    %89 = tpu.matmul %88, %84, %cst_31 {dimension_numbers = #tpu.dot_dimension_numbers<[1], [0], [0], [1], [0, 0, 1, 1], [], []>} : vector<16x96xf32>, vector<96x64xf32>, vector<16x64xf32> -> vector<16x64xf32>
    %90 = arith.index_cast %c0_i32 : i32 to index
    %c0_32 = arith.constant 0 : index
    %c0_33 = arith.constant 0 : index
    %91 = vector.load %arg3[%90, %c0_32, %c0_33] : memref<2x16x64xf32, #tpu.memory_space<vmem>>, vector<1x16x64xf32>
    %92 = vector.shape_cast %91 : vector<1x16x64xf32> to vector<16x64xf32>
    %93 = vector.shape_cast %89 : vector<16x64xf32> to vector<1x16x64xf32>
    tpu.vector_store %arg3[%90, %c0_32, %c0_33], %93 {strides = array<i32>} : memref<2x16x64xf32, #tpu.memory_space<vmem>>, vector<1x16x64xf32>,
    %c1_i32 = arith.constant 1 : i32
    %c2_i32_34 = arith.constant 2 : i32
    %94 = arith.muli %arg0, %c2_i32_34 : i32
    %95 = arith.addi %94, %c1_i32 : i32
    %c0_35 = arith.constant 0 : index
    %96 = arith.index_cast %95 : i32 to index
    %97 = memref.load %arg1[%c0_35, %96] : memref<2x2xi32, #tpu.memory_space<smem>>
    %98 = arith.sitofp %97 : i32 to f32
    %cst_36 = arith.constant 0.0833333358 : f32
    %99 = arith.mulf %98, %cst_36 : f32
    %c1_37 = arith.constant 1 : index
    %100 = arith.index_cast %95 : i32 to index
    %101 = memref.load %arg1[%c1_37, %100] : memref<2x2xi32, #tpu.memory_space<smem>>
    %102 = arith.sitofp %101 : i32 to f32
    %cst_38 = arith.constant 0.0833333358 : f32
    %103 = arith.mulf %102, %cst_38 : f32
    %104 = tpu.iota {dimensions = array<i32: 0>} : vector<16x24xi32>
    %105 = arith.sitofp %104 : vector<16x24xi32> to vector<16x24xf32>
    %106 = tpu.iota {dimensions = array<i32: 1>} : vector<16x24xi32>
    %107 = arith.sitofp %106 : vector<16x24xi32> to vector<16x24xf32>
    %cst_39 = arith.constant 2.000000e+00 : f32
    %108 = vector.broadcast %cst_39 : f32 to vector<16x24xf32>
    %109 = arith.mulf %108, %105 : vector<16x24xf32>
    %cst_40 = arith.constant 1.000000e+00 : f32
    %110 = vector.broadcast %cst_40 : f32 to vector<16x24xf32>
    %111 = arith.addf %109, %110 : vector<16x24xf32>
    %cst_41 = arith.constant 0.0416666679 : f32
    %112 = vector.broadcast %cst_41 : f32 to vector<16x24xf32>
    %113 = arith.mulf %112, %111 : vector<16x24xf32>
    %cst_42 = arith.constant -1.000000e+00 : f32
    %114 = vector.broadcast %cst_42 : f32 to vector<16x24xf32>
    %115 = arith.addf %114, %113 : vector<16x24xf32>
    %116 = vector.broadcast %103 : f32 to vector<16x24xf32>
    %117 = arith.addf %115, %116 : vector<16x24xf32>
    %cst_43 = arith.constant 1.000000e+00 : f32
    %118 = vector.broadcast %cst_43 : f32 to vector<16x24xf32>
    %119 = arith.addf %117, %118 : vector<16x24xf32>
    %cst_44 = arith.constant 2.400000e+01 : f32
    %120 = vector.broadcast %cst_44 : f32 to vector<16x24xf32>
    %121 = arith.mulf %119, %120 : vector<16x24xf32>
    %cst_45 = arith.constant 1.000000e+00 : f32
    %122 = vector.broadcast %cst_45 : f32 to vector<16x24xf32>
    %123 = arith.subf %121, %122 : vector<16x24xf32>
    %cst_46 = arith.constant 5.000000e-01 : f32
    %124 = vector.broadcast %cst_46 : f32 to vector<16x24xf32>
    %125 = arith.mulf %123, %124 : vector<16x24xf32>
    %126 = arith.subf %125, %107 : vector<16x24xf32>
    %127 = math.absf %126 : vector<16x24xf32>
    %cst_47 = arith.constant 1.000000e+00 : f32
    %128 = vector.broadcast %cst_47 : f32 to vector<16x24xf32>
    %129 = arith.subf %128, %127 : vector<16x24xf32>
    %cst_48 = arith.constant 0.000000e+00 : f32
    %130 = vector.broadcast %cst_48 : f32 to vector<16x24xf32>
    %131 = arith.maximumf %130, %129 : vector<16x24xf32>
    %132 = tpu.iota {dimensions = array<i32: 0>} : vector<96x64xi32>
    %133 = arith.sitofp %132 : vector<96x64xi32> to vector<96x64xf32>
    %134 = tpu.iota {dimensions = array<i32: 1>} : vector<96x64xi32>
    %135 = arith.sitofp %134 : vector<96x64xi32> to vector<96x64xf32>
    %cst_49 = arith.constant 5.000000e-01 : f32
    %136 = vector.broadcast %cst_49 : f32 to vector<96x64xf32>
    %137 = arith.addf %133, %136 : vector<96x64xf32>
    %cst_50 = arith.constant 0.0416666679 : f32
    %138 = vector.broadcast %cst_50 : f32 to vector<96x64xf32>
    %139 = arith.mulf %137, %138 : vector<96x64xf32>
    %140 = math.floor %139 : vector<96x64xf32>
    %cst_51 = arith.constant 2.400000e+01 : f32
    %141 = vector.broadcast %cst_51 : f32 to vector<96x64xf32>
    %142 = arith.mulf %140, %141 : vector<96x64xf32>
    %143 = arith.subf %133, %142 : vector<96x64xf32>
    %cst_52 = arith.constant 5.000000e-01 : f32
    %144 = vector.broadcast %cst_52 : f32 to vector<96x64xf32>
    %145 = arith.addf %135, %144 : vector<96x64xf32>
    %cst_53 = arith.constant 6.250000e-02 : f32
    %146 = vector.broadcast %cst_53 : f32 to vector<96x64xf32>
    %147 = arith.mulf %145, %146 : vector<96x64xf32>
    %148 = math.floor %147 : vector<96x64xf32>
    %cst_54 = arith.constant 1.600000e+01 : f32
    %149 = vector.broadcast %cst_54 : f32 to vector<96x64xf32>
    %150 = arith.mulf %148, %149 : vector<96x64xf32>
    %151 = arith.subf %135, %150 : vector<96x64xf32>
    %cst_55 = arith.constant 2.000000e+00 : f32
    %152 = vector.broadcast %cst_55 : f32 to vector<96x64xf32>
    %153 = arith.mulf %152, %151 : vector<96x64xf32>
    %cst_56 = arith.constant 1.000000e+00 : f32
    %154 = vector.broadcast %cst_56 : f32 to vector<96x64xf32>
    %155 = arith.addf %153, %154 : vector<96x64xf32>
    %cst_57 = arith.constant 0.0416666679 : f32
    %156 = vector.broadcast %cst_57 : f32 to vector<96x64xf32>
    %157 = arith.mulf %156, %155 : vector<96x64xf32>
    %cst_58 = arith.constant -1.000000e+00 : f32
    %158 = vector.broadcast %cst_58 : f32 to vector<96x64xf32>
    %159 = arith.addf %158, %157 : vector<96x64xf32>
    %160 = vector.broadcast %99 : f32 to vector<96x64xf32>
    %161 = arith.addf %159, %160 : vector<96x64xf32>
    %cst_59 = arith.constant 1.000000e+00 : f32
    %162 = vector.broadcast %cst_59 : f32 to vector<96x64xf32>
    %163 = arith.addf %161, %162 : vector<96x64xf32>
    %cst_60 = arith.constant 2.400000e+01 : f32
    %164 = vector.broadcast %cst_60 : f32 to vector<96x64xf32>
    %165 = arith.mulf %163, %164 : vector<96x64xf32>
    %cst_61 = arith.constant 1.000000e+00 : f32
    %166 = vector.broadcast %cst_61 : f32 to vector<96x64xf32>
    %167 = arith.subf %165, %166 : vector<96x64xf32>
    %cst_62 = arith.constant 5.000000e-01 : f32
    %168 = vector.broadcast %cst_62 : f32 to vector<96x64xf32>
    %169 = arith.mulf %167, %168 : vector<96x64xf32>
    %170 = arith.subf %169, %143 : vector<96x64xf32>
    %171 = math.absf %170 : vector<96x64xf32>
    %cst_63 = arith.constant 1.000000e+00 : f32
    %172 = vector.broadcast %cst_63 : f32 to vector<96x64xf32>
    %173 = arith.subf %172, %171 : vector<96x64xf32>
    %cst_64 = arith.constant 0.000000e+00 : f32
    %174 = vector.broadcast %cst_64 : f32 to vector<96x64xf32>
    %175 = arith.maximumf %174, %173 : vector<96x64xf32>
    %176 = arith.cmpf oeq, %140, %148 : vector<96x64xf32>
    %cst_65 = arith.constant 0.000000e+00 : f32
    %177 = vector.broadcast %cst_65 : f32 to vector<96x64xf32>
    %178 = arith.select %176, %175, %177 : vector<96x64xi1>, vector<96x64xf32>
    %179 = arith.index_cast %c1_i32 : i32 to index
    %c0_66 = arith.constant 0 : index
    %c0_67 = arith.constant 0 : index
    %180 = vector.load %arg2[%179, %c0_66, %c0_67] : memref<2x24x96xf32, #tpu.memory_space<vmem>>, vector<1x24x96xf32>
    %181 = vector.shape_cast %180 : vector<1x24x96xf32> to vector<24x96xf32>
    %cst_68 = arith.constant dense<0.000000e+00> : vector<16x96xf32>
    %182 = tpu.matmul %131, %181, %cst_68 {dimension_numbers = #tpu.dot_dimension_numbers<[1], [0], [0], [1], [0, 0, 1, 1], [], []>} : vector<16x24xf32>, vector<24x96xf32>, vector<16x96xf32> -> vector<16x96xf32>
    %cst_69 = arith.constant dense<0.000000e+00> : vector<16x64xf32>
    %183 = tpu.matmul %182, %178, %cst_69 {dimension_numbers = #tpu.dot_dimension_numbers<[1], [0], [0], [1], [0, 0, 1, 1], [], []>} : vector<16x96xf32>, vector<96x64xf32>, vector<16x64xf32> -> vector<16x64xf32>
    %184 = arith.index_cast %c1_i32 : i32 to index
    %c0_70 = arith.constant 0 : index
    %c0_71 = arith.constant 0 : index
    %185 = vector.load %arg3[%184, %c0_70, %c0_71] : memref<2x16x64xf32, #tpu.memory_space<vmem>>, vector<1x16x64xf32>
    %186 = vector.shape_cast %185 : vector<1x16x64xf32> to vector<16x64xf32>
    %187 = vector.shape_cast %183 : vector<16x64xf32> to vector<1x16x64xf32>
    tpu.vector_store %arg3[%184, %c0_70, %c0_71], %187 {strides = array<i32>} : memref<2x16x64xf32, #tpu.memory_space<vmem>>, vector<1x16x64xf32>,
    %c2_i32_72 = arith.constant 2 : i32
    return
  }
  func.func @transform_0(%arg0: i32, %arg1: memref<2x2xi32, #tpu.memory_space<smem>>) -> (i32, i32, i32) {
    %c0_i32 = arith.constant 0 : i32
    %c0_i32_0 = arith.constant 0 : i32
    %c0_i32_1 = arith.constant 0 : i32
    return %arg0, %c0_i32, %c0_i32_0 : i32, i32, i32
  }
  func.func @transform_1(%arg0: i32, %arg1: memref<2x2xi32, #tpu.memory_space<smem>>) -> (i32, i32, i32) {
    %c0_i32 = arith.constant 0 : i32
    %c0_i32_0 = arith.constant 0 : i32
    %c0_i32_1 = arith.constant 0 : i32
    return %arg0, %c0_i32, %c0_i32_0 : i32, i32, i32
  }
}

</mosaic_0001>

<bundles_post_ra>
// kernel: tpu_custom_call.1
= control target key start
LH: loop header
LB: loop body
LE: loop exit
PB: predicated region body
PF: predicated region fallthrough
CT: control target
= control target key end

     0   :  { %s635_s12 = smov [#allocation3]   ;;  %s937_s0 = inlined_call_operand.hbm [shape: s32[2,2], index: 0, kind: input, shape index: {}]   ;;  %s938_s1 = inlined_call_operand.hbm [shape: f32[2,24,96], index: 1, kind: input, shape index: {}]   ;;  %s939_s2 = inlined_call_operand.hbm [shape: f32[2,16,64], index: 2, kind: output, shape index: {}]  }
   0x1   :  { %s8_s11 = sshll.u32 %s937_s0, 4  ;;  %s9_s11 = int_to_ptr.hbm [resolvable:$true] %s8_s11 }
   0x2   :  { %11 = dma.hbm_to_smem %s9_s11, 32, %s635_s12, [#allocation2] }
   0x3   :  { %629 = dma.done.wait [#allocation2], 32 }
   0x4   :  { %630 = vsyncadd [#allocation2], 4294967264 }
   0x5   :  { %14 = sfence }
   0x6   :  { %15 = vsyncpa [#allocation5], 0 }
   0x7   :  { %16 = vsyncpa [#allocation6], 0  ;;  %s21_s15 = sshll.u32 %s938_s1, 4  ;;  %s636_s16 = smov [#allocation4]   ;;  %s22_s15 = int_to_ptr.hbm [resolvable:$true] %s21_s15 }
   0x8   :  { %s23_s17 = sshll.u32 %s636_s16, 4  ;;  %s637_s18 = smov 128   ;;  %s24_s17 = int_to_ptr.vmem [resolvable:$true] %s23_s17 }
   0x9   :  { %s638_s19 = smov 8  }
   0xa   :  { %29 = dma.hbm_to_vmem [thread:$0]  %s22_s15, 768, %s24_s17, [#allocation5], %s637_s18, %s637_s18, %s638_s19  }
   0xb   :  { %631 = dma.done.wait [#allocation5], 768  }
   0xc   :  { %632 = vsyncadd [#allocation5], 4294966528  ;;  %v48_v0 = vlaneseq  ;;  %s664_s0 = sld [smem:[#allocation3]]  ;;  %v418_v9 = vld [vmem:[#allocation4 + $0x28] sm:$0xff]  ;;  %v417_v10 = vld [vmem:[#allocation4 + $0x20] sm:$0xff]  ;;  %vm253_vm0 = vcmask 195584  }
   0xd   :  { %s520_s20 = sld [smem:[#allocation3 + $0x81]]  ;;  %438 = vmatpush.msra.mxu2 %v418_v9  ;;  %v252_v13 = vld [vmem:[#allocation4 + $0x10] sm:$0xff]  ;;  %v251_v15 = vld [vmem:[#allocation4 + $0x8] sm:$0xff]  ;;  %v416_v16 = vld [vmem:[#allocation4 + $0x18] sm:$0xff]  ;;  %vm283_vm13 = vcmask 785408   ;;  %vm313_vm14 = vcmask 523264  }
   0xe   :  { %v666_v1 = vshrl.u32 %v48_v0, 7  ;;  %v54_v2 = vand.u32 127, %v48_v0  ;;  %s674_s1 = sld [smem:[#allocation3 + $0x80]]  ;;  %273 = vmatpush.msra.mxu0 %v252_v13  ;;  %v250_v21 = vld [vmem:[#allocation4] sm:$0xff]  ;;  %s639_s30 = smov [#allocation7]  }
   0xf   :  { %s676_s21 = sld [smem:[#allocation3 + $0x1]]  ;;  %439 = vmatpush.msra.mxu2 %v417_v10  ;;  %s484_s3 = sshll.u32 %s639_s30, 4  ;;  %s485_s3 = int_to_ptr.vmem [resolvable:$true] %s484_s3 }
  0x10   :  { %v669_v3 = vcvt.s32.f32 %v666_v1  ;;  %v671_v4 = vcvt.s32.f32 %v54_v2  ;;  %v50_v5 = vadd.s32 8, %v666_v1  ;;  %v92_v17 = vadd.s32 88, %v666_v1  ;;  %274 = vmatpush.msra.mxu0 %v251_v15  ;;  %s486_s6 = sshll.u32 %s939_s2, 4  ;;  %s487_s6 = int_to_ptr.hbm [resolvable:$true] %s486_s6 }
  0x11   :  { %v688_v22 = vadd.s32 80, %v666_v1  ;;  %440 = vmatpush.msra.mxu2 %v416_v16  ;;  %v695_v30 = vadd.s32 72, %v666_v1  ;;  %v89_v9 = vadd.s32 64, %v666_v1 }
  0x12   :  { %v56_v6 = vmul.f32 2.0, %v669_v3  ;;  %v163_v7 = vadd.f32 0.5, %v671_v4  ;;  %v680_v8 = vcvt.s32.f32 %v50_v5  ;;  %v102_v23 = vcvt.s32.f32 %v92_v17  ;;  %s36_s25 = scvt.s32.f32 %s664_s0  ;;  %275 = vmatpush.msra.mxu0 %v250_v21 }
  0x13   :  { %s328_s22 = scvt.s32.f32 %s520_s20  ;;  %v101_v29 = vcvt.s32.f32 %v688_v22  ;;  %v100_v38 = vcvt.s32.f32 %v695_v30  ;;  %v99_v17 = vcvt.s32.f32 %v89_v9 }
  0x14   :  { %v58_v11 = vadd.f32 1.0, %v56_v6  ;;  %v164_v12 = vmul.f32 0.0625, %v163_v7  ;;  %v57_v14 = vmul.f32 2.0, %v680_v8  ;;  %s46_s23 = scvt.s32.f32 %s674_s1  ;;  %v114_v28 = vadd.f32 0.5, %v102_v23  ;;  %s701_s28 = smul.f32 0.083333336, %s36_s25 }
  0x15   :  { %s329_s24 = smul.f32 0.083333336, %s328_s22  ;;  %s318_s27 = scvt.s32.f32 %s676_s21  ;;  %v113_v37 = vadd.f32 0.5, %v101_v29  ;;  %v112_v53 = vadd.f32 0.5, %v100_v38 }
  0x16   :  { %v60_v18 = vmul.f32 0.041666668, %v58_v11  ;;  %v684_v19 = vfloor.f32 %v164_v12  ;;  %v59_v20 = vadd.f32 1.0, %v57_v14  ;;  %s47_s26 = smul.f32 0.083333336, %s46_s23  ;;  %v172_v58 = vstv %s701_s28 }
  0x17   :  { %v330_v27 = vstv %s329_s24  ;;  %v698_v36 = vmul.f32 0.041666668, %v114_v28  ;;  %s703_s29 = smul.f32 0.083333336, %s318_s27  ;;  %v706_v45 = vmul.f32 0.041666668, %v113_v37 }
  0x18   :  { %v62_v24 = vadd.f32 -1.0, %v60_v18  ;;  %v166_v25 = vmul.f32 16.0, %v684_v19  ;;  %v61_v26 = vmul.f32 0.041666668, %v59_v20  ;;  %v64_v34 = vstv %s47_s26 }
  0x19   :  { %v138_v44 = vfloor.f32 %v698_v36  ;;  %v137_v52 = vfloor.f32 %v706_v45  ;;  %v349_v59 = vstv %s703_s29  ;;  %v124_v7 = vmul.f32 0.041666668, %v112_v53 }
  0x1a   :  { %v167_v31 = vsub.f32 %v671_v4, %v166_v25  ;;  %v331_v32 = vadd.f32 %v330_v27, %v62_v24  ;;  %v63_v33 = vadd.f32 -1.0, %v61_v26  ;;  %v65_v35 = vadd.f32 %v64_v34, %v62_v24 }
  0x1b   :  { %v150_v51 = vmul.f32 24.0, %v138_v44  ;;  %v149_v6 = vmul.f32 24.0, %v137_v52  ;;  %v136_v16 = vfloor.f32 %v124_v7  ;;  %vm729_vm1 = vcmp.eq.f32.partialorder %v138_v44, %v684_v19 }
  0x1c   :  { %v168_v39 = vmul.f32 2.0, %v167_v31  ;;  %v333_v40 = vadd.f32 1.0, %v331_v32  ;;  %v332_v41 = vadd.f32 %v330_v27, %v63_v33  ;;  %v66_v42 = vadd.f32 %v64_v34, %v63_v33 }
  0x1d   :  { %v67_v43 = vadd.f32 1.0, %v65_v35  ;;  %v713_v61 = vsub.f32 %v102_v23, %v150_v51  ;;  %v161_v25 = vsub.f32 %v101_v29, %v149_v6  ;;  %v148_v26 = vmul.f32 24.0, %v136_v16 }
  0x1e   :  { %v169_v46 = vadd.f32 1.0, %v168_v39  ;;  %v335_v47 = vmul.f32 24.0, %v333_v40  ;;  %v334_v48 = vadd.f32 1.0, %v332_v41  ;;  %v68_v49 = vadd.f32 1.0, %v66_v42 }
  0x1f   :  { %v69_v50 = vmul.f32 24.0, %v67_v43  ;;  %v160_v34 = vsub.f32 %v100_v38, %v148_v26  ;;  %v111_v35 = vadd.f32 0.5, %v99_v17  ;;  %vm735_vm2 = vcmp.eq.f32.partialorder %v137_v52, %v684_v19 }
  0x20   :  { %v170_v54 = vmul.f32 0.041666668, %v169_v46  ;;  %v521_v55 = vadd.f32 -1.0, %v335_v47  ;;  %v336_v56 = vmul.f32 24.0, %v334_v48  ;;  %v70_v57 = vmul.f32 24.0, %v68_v49 }
  0x21   :  { %v500_v60 = vadd.f32 -1.0, %v69_v50  ;;  %v123_v45 = vmul.f32 0.041666668, %v111_v35  ;;  %v88_v46 = vadd.s32 56, %v666_v1  ;;  %v740_v53 = vadd.s32 48, %v666_v1 }
  0x22   :  { %v171_v62 = vadd.f32 -1.0, %v170_v54  ;;  %v339_v63 = vmul.f32 0.5, %v521_v55  ;;  %v522_v0 = vadd.f32 -1.0, %v336_v56  ;;  %v501_v2 = vadd.f32 -1.0, %v70_v57 }
  0x23   :  { %v73_v5 = vmul.f32 0.5, %v500_v60  ;;  %v135_v50 = vfloor.f32 %v123_v45  ;;  %v98_v51 = vcvt.s32.f32 %v88_v46  ;;  %vm749_vm3 = vcmp.eq.f32.partialorder %v136_v16, %v684_v19 }
  0x24   :  { %v173_v10 = vadd.f32 %v172_v58, %v171_v62  ;;  %v341_v11 = vsub.f32 %v339_v63, %v671_v4  ;;  %v350_v12 = vadd.f32 %v349_v59, %v171_v62  ;;  %v340_v13 = vmul.f32 0.5, %v522_v0 }
  0x25   :  { %v75_v14 = vsub.f32 %v73_v5, %v671_v4  ;;  %v74_v15 = vmul.f32 0.5, %v501_v2  ;;  %v147_v56 = vmul.f32 24.0, %v135_v50  ;;  %v110_v58 = vadd.f32 0.5, %v98_v51 }
  0x26   :  { %v174_v18 = vadd.f32 1.0, %v173_v10  ;;  %v343_v20 = vand.u32 2147483647, %v341_v11  ;;  %v351_v21 = vadd.f32 1.0, %v350_v12  ;;  %v342_v22 = vsub.f32 %v340_v13, %v671_v4 }
  0x27   :  { %v77_v23 = vand.u32 2147483647, %v75_v14  ;;  %v76_v24 = vsub.f32 %v74_v15, %v671_v4  ;;  %v755_v59 = vadd.s32 40, %v666_v1  ;;  %v159_v5 = vsub.f32 %v99_v17, %v147_v56 }
  0x28   :  { %v175_v27 = vmul.f32 24.0, %v174_v18  ;;  %v345_v28 = vsub.f32 1.0, %v343_v20  ;;  %v352_v30 = vmul.f32 24.0, %v351_v21  ;;  %v344_v31 = vand.u32 2147483647, %v342_v22 }
  0x29   :  { %v79_v32 = vsub.f32 1.0, %v77_v23  ;;  %v78_v33 = vand.u32 2147483647, %v76_v24  ;;  %v758_v6 = vmul.f32 0.041666668, %v110_v58  ;;  %vm764_vm4 = vcmp.eq.f32.partialorder %v135_v50, %v684_v19 }
  0x2a   :  { %v502_v37 = vadd.f32 -1.0, %v175_v27  ;;  %v347_v39 = vmax.f32 %v345_v28, 0.0  ;;  %v523_v40 = vadd.f32 -1.0, %v352_v30  ;;  %v346_v41 = vsub.f32 1.0, %v344_v31 }
  0x2b   :  { %v81_v42 = vmax.f32 %v79_v32, 0.0  ;;  %v80_v43 = vsub.f32 1.0, %v78_v33  ;;  %v134_v15 = vfloor.f32 %v758_v6  ;;  %v97_v27 = vcvt.s32.f32 %v740_v53 }
  0x2c   :  { %v721_v4 = vmul.f32 0.5, %v502_v37  ;;  %v723_v29 = vmul.f32 0.5, %v523_v40  ;;  %524 = vmatmul.msk.f32.vlgmr.msra.gmra.mxu2 %vm253_vm0, %v347_v39  ;;  %v348_v47 = vmax.f32 %v346_v41, 0.0  ;;  %v96_v32 = vcvt.s32.f32 %v755_v59 }
  0x2d   :  { %503 = vmatmul.msk.f32.vlgmr.msra.gmra.mxu0 %vm253_vm0, %v81_v42  ;;  %v82_v48 = vmax.f32 %v80_v43, 0.0  ;;  %v146_v24 = vmul.f32 24.0, %v134_v15  ;;  %v781_v33 = vadd.s32 32, %v666_v1  ;;  %v84_v37 = vadd.s32 24, %v666_v1 }
  0x2e   :  { %v366_v36 = vsub.f32 %v723_v29, %v713_v61  ;;  %v365_v44 = vsub.f32 %v723_v29, %v161_v25  ;;  %v364_v54 = vsub.f32 %v723_v29, %v160_v34  ;;  %v189_v55 = vsub.f32 %v721_v4, %v713_v61 }
  0x2f   :  { %v188_v57 = vsub.f32 %v721_v4, %v161_v25  ;;  %v187_v0 = vsub.f32 %v721_v4, %v160_v34  ;;  %v363_v13 = vsub.f32 %v723_v29, %v159_v5  ;;  %v186_v28 = vsub.f32 %v721_v4, %v159_v5 }
  0x30   :  { %v378_v60 = vand.u32 2147483647, %v366_v36  ;;  %v377_v62 = vand.u32 2147483647, %v365_v44  ;;  %v376_v63 = vand.u32 2147483647, %v364_v54  ;;  %v158_v31 = vsub.f32 %v98_v51, %v146_v24 }
  0x31   :  { %v201_v2 = vand.u32 2147483647, %v189_v55  ;;  %v200_v61 = vand.u32 2147483647, %v188_v57  ;;  %v199_v11 = vand.u32 2147483647, %v187_v0  ;;  %vm812_vm5 = vcmp.eq.f32.partialorder %v134_v15, %v684_v19 }
  0x32   :  { %v390_v7 = vsub.f32 1.0, %v378_v60  ;;  %v389_v9 = vsub.f32 1.0, %v377_v62  ;;  %v388_v10 = vsub.f32 1.0, %v376_v63  ;;  %v375_v22 = vand.u32 2147483647, %v363_v13 }
  0x33   :  { %v213_v12 = vsub.f32 1.0, %v201_v2  ;;  %v212_v14 = vsub.f32 1.0, %v200_v61  ;;  %v211_v20 = vsub.f32 1.0, %v199_v11  ;;  %v109_v34 = vadd.f32 0.5, %v97_v27 }
  0x34   :  { %525 = vmatmul.msk.f32.gmra.mxu2 %vm253_vm0, %v348_v47  ;;  %v402_v16 = vmax.f32 %v390_v7, 0.0  ;;  %v401_v18 = vmax.f32 %v389_v9, 0.0  ;;  %v400_v25 = vmax.f32 %v388_v10, 0.0  ;;  %v387_v30 = vsub.f32 1.0, %v375_v22 }
  0x35   :  { %504 = vmatmul.msk.f32.gmra.mxu0 %vm253_vm0, %v82_v48  ;;  %v225_v21 = vmax.f32 %v213_v12, 0.0  ;;  %v224_v23 = vmax.f32 %v212_v14, 0.0  ;;  %v223_v26 = vmax.f32 %v211_v20, 0.0  ;;  %v198_v35 = vand.u32 2147483647, %v186_v28 }
  0x36   :  { %526 = vmatpush.msk.msrb.mxu2 %vm729_vm1, %v402_v16  ;;  %552 = vmatpush.msk.msra.mxu3 %vm729_vm1, %v402_v16  ;;  %v789_v39 = vadd.s32 16, %v666_v1  ;;  %v399_v40 = vmax.f32 %v387_v30, 0.0  ;;  %v362_v41 = vsub.f32 %v723_v29, %v158_v31  ;;  %v108_v42 = vadd.f32 0.5, %v96_v32 }
  0x37   :  { %505 = vmatpush.msk.msrb.mxu0 %vm729_vm1, %v225_v21  ;;  %540 = vmatpush.msk.msra.mxu1 %vm729_vm1, %v225_v21  ;;  %v185_v43 = vsub.f32 %v721_v4, %v158_v31  ;;  %v121_v45 = vmul.f32 0.041666668, %v109_v34  ;;  %v210_v46 = vsub.f32 1.0, %v198_v35  ;;  %v95_v1 = vcvt.s32.f32 %v781_v33 }
  0x38   :  { %527 = vmatpush.msk.msrb.mxu2 %vm735_vm2, %v401_v18  ;;  %553 = vmatpush.msk.msra.mxu3 %vm735_vm2, %v401_v18  ;;  %v94_v47 = vcvt.s32.f32 %v84_v37  ;;  %v374_v38 = vand.u32 2147483647, %v362_v41  ;;  %v120_v48 = vmul.f32 0.041666668, %v108_v42  ;;  %v93_v49 = vcvt.s32.f32 %v789_v39 }
  0x39   :  { %506 = vmatpush.msk.msrb.mxu0 %vm735_vm2, %v224_v23  ;;  %541 = vmatpush.msk.msra.mxu1 %vm735_vm2, %v224_v23  ;;  %v197_v50 = vand.u32 2147483647, %v185_v43  ;;  %v133_v51 = vfloor.f32 %v121_v45  ;;  %v222_v53 = vmax.f32 %v210_v46, 0.0  ;;  %v107_v36 = vadd.f32 0.5, %v95_v1 }
  0x3a   :  { %528 = vmatpush.msk.msrb.mxu2 %vm749_vm3, %v400_v25  ;;  %554 = vmatpush.msk.msra.mxu3 %vm749_vm3, %v400_v25  ;;  %v106_v44 = vadd.f32 0.5, %v94_v47  ;;  %v386_v54 = vsub.f32 1.0, %v374_v38  ;;  %v132_v55 = vfloor.f32 %v120_v48  ;;  %v105_v57 = vadd.f32 0.5, %v93_v49 }
  0x3b   :  { %507 = vmatpush.msk.msrb.mxu0 %vm749_vm3, %v223_v26  ;;  %542 = vmatpush.msk.msra.mxu1 %vm749_vm3, %v223_v26  ;;  %v209_v56 = vsub.f32 1.0, %v197_v50  ;;  %v145_v58 = vmul.f32 24.0, %v133_v51  ;;  %v119_v59 = vmul.f32 0.041666668, %v107_v36  ;;  %v104_v9 = vadd.f32 0.5, %v680_v8 }
  0x3c   :  { %529 = vmatpush.msk.msrb.mxu2 %vm764_vm4, %v399_v40  ;;  %555 = vmatpush.msk.msra.mxu3 %vm764_vm4, %v399_v40  ;;  %v818_v60 = vmul.f32 0.041666668, %v106_v44  ;;  %v398_v62 = vmax.f32 %v386_v54, 0.0  ;;  %v144_v63 = vmul.f32 24.0, %v132_v55  ;;  %v823_v6 = vmul.f32 0.041666668, %v105_v57 }
  0x3d   :  { %508 = vmatpush.msk.msrb.mxu0 %vm764_vm4, %v222_v53  ;;  %543 = vmatpush.msk.msra.mxu1 %vm764_vm4, %v222_v53  ;;  %v221_v0 = vmax.f32 %v209_v56, 0.0  ;;  %v157_v2 = vsub.f32 %v97_v27, %v145_v58  ;;  %v131_v5 = vfloor.f32 %v119_v59  ;;  %vm837_vm6 = vcmp.eq.f32.partialorder %v133_v51, %v684_v19 }
  0x3e   :  { %v130_v61 = vfloor.f32 %v818_v60  ;;  %530 = vmatpush.msk.msrb.mxu2 %vm812_vm5, %v398_v62  ;;  %v156_v7 = vsub.f32 %v96_v32, %v144_v63  ;;  %556 = vmatpush.msk.msra.mxu3 %vm812_vm5, %v398_v62  ;;  %v129_v21 = vfloor.f32 %v823_v6  ;;  %v116_v25 = vmul.f32 0.041666668, %v104_v9 }
  0x3f   :  { %509 = vmatpush.msk.msrb.mxu0 %vm812_vm5, %v221_v0  ;;  %v361_v10 = vsub.f32 %v723_v29, %v157_v2  ;;  %v143_v11 = vmul.f32 24.0, %v131_v5  ;;  %v184_v12 = vsub.f32 %v721_v4, %v157_v2  ;;  %544 = vmatpush.msk.msra.mxu1 %vm812_vm5, %v221_v0  ;;  %vm846_vm7 = vcmp.eq.f32.partialorder %v132_v55, %v684_v19 }
  0x40   :  { %v360_v14 = vsub.f32 %v723_v29, %v156_v7  ;;  %v142_v15 = vmul.f32 24.0, %v130_v61  ;;  %v183_v16 = vsub.f32 %v721_v4, %v156_v7  ;;  %v141_v30 = vmul.f32 24.0, %v129_v21 }
  0x41   :  { %v373_v18 = vand.u32 2147483647, %v361_v10  ;;  %v155_v17 = vsub.f32 %v95_v1, %v143_v11  ;;  %v196_v20 = vand.u32 2147483647, %v184_v12  ;;  %vm859_vm8 = vcmp.eq.f32.partialorder %v131_v5, %v684_v19 }
  0x42   :  { %v372_v22 = vand.u32 2147483647, %v360_v14  ;;  %v154_v23 = vsub.f32 %v94_v47, %v142_v15  ;;  %v195_v24 = vand.u32 2147483647, %v183_v16  ;;  %v153_v40 = vsub.f32 %v93_v49, %v141_v30 }
  0x43   :  { %v385_v26 = vsub.f32 1.0, %v373_v18  ;;  %v359_v27 = vsub.f32 %v723_v29, %v155_v17  ;;  %v208_v28 = vsub.f32 1.0, %v196_v20  ;;  %v182_v45 = vsub.f32 %v721_v4, %v155_v17 }
  0x44   :  { %v384_v32 = vsub.f32 1.0, %v372_v22  ;;  %v358_v33 = vsub.f32 %v723_v29, %v154_v23  ;;  %v207_v34 = vsub.f32 1.0, %v195_v24  ;;  %v357_v1 = vsub.f32 %v723_v29, %v153_v40 }
  0x45   :  { %v397_v35 = vmax.f32 %v385_v26, 0.0  ;;  %v371_v37 = vand.u32 2147483647, %v359_v27  ;;  %v220_v39 = vmax.f32 %v208_v28, 0.0  ;;  %v128_v47 = vfloor.f32 %v116_v25 }
  0x46   :  { %v396_v41 = vmax.f32 %v384_v32, 0.0  ;;  %v370_v42 = vand.u32 2147483647, %v358_v33  ;;  %v219_v43 = vmax.f32 %v207_v34, 0.0  ;;  %v181_v38 = vsub.f32 %v721_v4, %v154_v23 }
  0x47   :  { %531 = vmatpush.msk.msrb.mxu2 %vm837_vm6, %v397_v35  ;;  %v383_v46 = vsub.f32 1.0, %v371_v37  ;;  %510 = vmatpush.msk.msrb.mxu0 %vm837_vm6, %v220_v39  ;;  %v194_v49 = vand.u32 2147483647, %v182_v45  ;;  %v369_v53 = vand.u32 2147483647, %v357_v1  ;;  %v140_v36 = vmul.f32 24.0, %v128_v47 }
  0x48   :  { %v382_v50 = vsub.f32 1.0, %v370_v42  ;;  %557 = vmatpush.msk.msra.mxu3 %vm837_vm6, %v397_v35  ;;  %545 = vmatpush.msk.msra.mxu1 %vm837_vm6, %v220_v39  ;;  %vm872_vm9 = vcmp.eq.f32.partialorder %v130_v61, %v684_v19  ;;  %v193_v56 = vand.u32 2147483647, %v181_v38  ;;  %vm884_vm10 = vcmp.eq.f32.partialorder %v129_v21, %v684_v19 }
  0x49   :  { %532 = vmatpush.msk.msrb.mxu2 %vm846_vm7, %v396_v41  ;;  %v395_v51 = vmax.f32 %v383_v46, 0.0  ;;  %511 = vmatpush.msk.msrb.mxu0 %vm846_vm7, %v219_v43  ;;  %v206_v55 = vsub.f32 1.0, %v194_v49  ;;  %v381_v57 = vsub.f32 1.0, %v369_v53  ;;  %v152_v52 = vsub.f32 %v680_v8, %v140_v36 }
  0x4a   :  { %v394_v54 = vmax.f32 %v382_v50, 0.0  ;;  %558 = vmatpush.msk.msra.mxu3 %vm846_vm7, %v396_v41  ;;  %546 = vmatpush.msk.msra.mxu1 %vm846_vm7, %v219_v43  ;;  %v205_v60 = vsub.f32 1.0, %v193_v56  ;;  %vm908_vm11 = vcmp.eq.f32.partialorder %v128_v47, %v684_v19  ;;  %v103_v6 = vadd.f32 0.5, %v669_v3 }
  0x4b   :  { %533 = vmatpush.msk.msrb.mxu2 %vm859_vm8, %v395_v51  ;;  %v218_v59 = vmax.f32 %v206_v55, 0.0  ;;  %v393_v62 = vmax.f32 %v381_v57, 0.0  ;;  %v356_v63 = vsub.f32 %v723_v29, %v152_v52  ;;  %v180_v14 = vsub.f32 %v721_v4, %v153_v40 }
  0x4c   :  { %559 = vmatpush.msk.msra.mxu3 %vm859_vm8, %v395_v51  ;;  %v217_v8 = vmax.f32 %v205_v60, 0.0  ;;  %v115_v7 = vmul.f32 0.041666668, %v103_v6  ;;  %v179_v18 = vsub.f32 %v721_v4, %v152_v52 }
  0x4d   :  { %534 = vmatpush.msk.msrb.mxu2 %vm872_vm9, %v394_v54  ;;  %512 = vmatpush.msk.msrb.mxu0 %vm859_vm8, %v218_v59  ;;  %v368_v0 = vand.u32 2147483647, %v356_v63  ;;  %v192_v16 = vand.u32 2147483647, %v180_v14 }
  0x4e   :  { %560 = vmatpush.msk.msra.mxu3 %vm872_vm9, %v394_v54  ;;  %547 = vmatpush.msk.msra.mxu1 %vm859_vm8, %v218_v59  ;;  %v127_v9 = vfloor.f32 %v115_v7  ;;  %v191_v21 = vand.u32 2147483647, %v179_v18 }
  0x4f   :  { %535 = vmatpush.msk.msrb.mxu2 %vm884_vm10, %v393_v62  ;;  %513 = vmatpush.msk.msrb.mxu0 %vm872_vm9, %v217_v8  ;;  %v380_v2 = vsub.f32 1.0, %v368_v0  ;;  %v204_v20 = vsub.f32 1.0, %v192_v16 }
  0x50   :  { %561 = vmatpush.msk.msra.mxu3 %vm884_vm10, %v393_v62  ;;  %548 = vmatpush.msk.msra.mxu1 %vm872_vm9, %v217_v8  ;;  %v139_v10 = vmul.f32 24.0, %v127_v9  ;;  %vm226_vm12 = vcmp.eq.f32.partialorder %v127_v9, %v684_v19  ;;  %v203_v24 = vsub.f32 1.0, %v191_v21 }
  0x51   :  { %v392_v61 = vmax.f32 %v380_v2, 0.0  ;;  %v216_v23 = vmax.f32 %v204_v20, 0.0 }
  0x52   :  { %v151_v11 = vsub.f32 %v669_v3, %v139_v10 }
  0x53   :  { %536 = vmatpush.msk.msrb.mxu2 %vm908_vm11, %v392_v61  ;;  %562 = vmatpush.msk.msra.mxu3 %vm908_vm11, %v392_v61 }
  0x54   :  { %v355_v12 = vsub.f32 %v723_v29, %v151_v11  ;;  %v178_v22 = vsub.f32 %v721_v4, %v151_v11  ;;  %514 = vmatpush.msk.msrb.mxu0 %vm884_vm10, %v216_v23  ;;  %v215_v29 = vmax.f32 %v203_v24, 0.0  ;;  %549 = vmatpush.msk.msra.mxu1 %vm884_vm10, %v216_v23 }
  0x56   :  { %v367_v13 = vand.u32 2147483647, %v355_v12  ;;  %v190_v3 = vand.u32 2147483647, %v178_v22  ;;  %515 = vmatpush.msk.msrb.mxu0 %vm908_vm11, %v215_v29  ;;  %550 = vmatpush.msk.msra.mxu1 %vm908_vm11, %v215_v29 }
  0x58   :  { %v379_v15 = vsub.f32 1.0, %v367_v13  ;;  %v202_v25 = vsub.f32 1.0, %v190_v3 }
  0x5a   :  { %v391_v17 = vmax.f32 %v379_v15, 0.0  ;;  %v214_v26 = vmax.f32 %v202_v25, 0.0 }
  0x5c   :  { %537 = vmatpush.msk.msrb.mxu2 %vm226_vm12, %v391_v17  ;;  %563 = vmatpush.msk.msra.mxu3 %vm226_vm12, %v391_v17 }
  0x5d   :  { %516 = vmatpush.msk.msrb.mxu0 %vm226_vm12, %v214_v26  ;;  %551 = vmatpush.msk.msra.mxu1 %vm226_vm12, %v214_v26 }
  0xaa   :  { %v277_v19 = vpop.f32.mrf.mxu0 }
  0xab   :  { %517 = vmatmul.msk.f32.vlgmr.msrb.gmra.mxu0 %vm283_vm13, %v277_v19 }
  0xaf   :  { %v442_v4 = vpop.f32.mrf.mxu2 }
  0xb0   :  { %538 = vmatmul.msk.f32.vlgmr.msrb.gmra.mxu2 %vm283_vm13, %v442_v4 }
  0xb2   :  { %v280_v27 = vpop.f32.mrf.mxu0 }
  0xb3   :  { %518 = vmatmul.msk.f32.vlgmr.msra.gmra.mxu1 %vm283_vm13, %v280_v27 }
  0xb7   :  { %v445_v28 = vpop.f32.mrf.mxu2 }
  0xb8   :  { %539 = vmatmul.msk.f32.vlgmr.msra.gmra.mxu3 %vm283_vm13, %v445_v28 }
 0x128   :  { %v307_v30 = vpop.f32.mrf.mxu0 }
 0x129   :  { %314 = vst.msk [vmem:[#allocation7] sm:$0xff] %vm313_vm14, %v307_v30 }
 0x130   :  { %v310_v31 = vpop.f32.mrf.mxu1 }
 0x131   :  { %315 = vst.msk [vmem:[#allocation7 + $0x8] sm:$0xff] %vm313_vm14, %v310_v31 }
 0x133   :  { %v471_v32 = vpop.f32.mrf.mxu2 }
 0x134   :  { %478 = vst.msk [vmem:[#allocation7 + $0x10] sm:$0xff] %vm313_vm14, %v471_v32 }
 0x13b   :  { %v474_v33 = vpop.f32.mrf.mxu3 }
 0x13c   :  { %479 = vst.msk [vmem:[#allocation7 + $0x18] sm:$0xff] %vm313_vm14, %v474_v33 }
 0x13d   :  { %492 = dma.vmem_to_hbm [thread:$0]  %s485_s3, 512, %s487_s6, [#allocation6], %s637_s18, %s637_s18, %s638_s19  }
 0x13e   :  { %633 = dma.done.wait [#allocation6], 512  }
 0x13f   :  { %634 = vsyncadd [#allocation6], 4294966784 }
 0x140   :  { %497 = vsyncpa [#allocation5], 1 }
 0x141   :  { %498 = vsyncpa [#allocation6], 1 }

</bundles_post_ra>
